<compile_context>
chip_gen: v7x
topology: tpu7x:2x2x1
jax: 0.10.0
libtpu: 0.0.40
codegen_flags: <defaults>
</compile_context>

<pallas_src>
import jax
import jax.numpy as jnp
from jax.experimental import pallas as pl
from jax.experimental.pallas import tpu as pltpu

LANES = 128


def _cdiv(a: int, b: int) -> int:
    return -(-a // b)


def contrastive_loss(distances: jax.Array, labels: jax.Array, margin, *, tb: int = 1024) -> jax.Array:
    """Pallas TPU implementation of ContrastiveLoss.forward (returns scalar mean)."""
    assert distances.shape == labels.shape
    margin = float(margin)

    n = int(distances.size)
    d_flat = distances.reshape(-1).astype(jnp.float32)
    # labels are binary -> bf16 is exact and halves that HBM stream
    l_flat = labels.reshape(-1).astype(jnp.bfloat16)

    rows = _cdiv(n, LANES)
    # split work into 2 parallel chunks when there is enough of it (v7x megacore); 1 otherwise
    nc = 2 if rows >= 2 * tb else 1
    tb_eff = min(tb, _cdiv(_cdiv(rows, nc), 8) * 8)      # row tile, multiple of 8 sublanes
    tiles_per_chunk = _cdiv(rows, nc * tb_eff)
    rows_padded = nc * tiles_per_chunk * tb_eff
    n_padded = rows_padded * LANES

    pad = n_padded - n
    # pad with (d=0, label=1): contribution = 1*0 + 0*clamp(m,0)^2 = 0
    d_flat = jnp.pad(d_flat, (0, pad), constant_values=0.0)
    l_flat = jnp.pad(l_flat, (0, pad), constant_values=1.0)

    d2 = d_flat.reshape(rows_padded, LANES)
    l2 = l_flat.reshape(rows_padded, LANES)

    def kernel(d_ref, l_ref, out_ref, acc_ref):
        i = pl.program_id(1)

        @pl.when(i == 0)
        def _():
            acc_ref[...] = jnp.zeros_like(acc_ref)

        d = d_ref[...]                                   # (TB, 128) f32
        lab = l_ref[...].astype(jnp.float32)             # bf16 -> f32 (exact for 0/1)

        hinge = jnp.maximum(margin - d, 0.0)             # clamp(margin - d, min=0)
        acc_ref[...] += lab * (d * d) + (1.0 - lab) * (hinge * hinge)   # pure VPU

        @pl.when(i == pl.num_programs(1) - 1)
        def _():
            # collapse TB rows onto an (8,128) vreg-shaped partial (vreg adds only)
            out_ref[...] = acc_ref[...].reshape(tb_eff // 8, 8, LANES).sum(axis=0)

    partials = pl.pallas_call(
        kernel,
        out_shape=jax.ShapeDtypeStruct((nc * 8, LANES), jnp.float32),
        grid=(nc, tiles_per_chunk),
        in_specs=[
            pl.BlockSpec((tb_eff, LANES), lambda c, i: (c * tiles_per_chunk + i, 0)),
            pl.BlockSpec((tb_eff, LANES), lambda c, i: (c * tiles_per_chunk + i, 0)),
        ],
        out_specs=pl.BlockSpec((8, LANES), lambda c, i: (c, 0)),
        scratch_shapes=[pltpu.VMEM((tb_eff, LANES), jnp.float32)],
        compiler_params=pltpu.CompilerParams(
            dimension_semantics=("parallel", "arbitrary"),
            vmem_limit_bytes=32 * 1024 * 1024,
        ),
    )(d2, l2)

    # final tiny cross-lane/sublane reduce + mean over the TRUE element count
    return jnp.sum(partials) / jnp.float32(n)


def contrastive_loss_ref(distances, labels, margin):
    d = distances.astype(jnp.float32)
    lab = labels.astype(jnp.float32)
    return jnp.mean(lab * d ** 2 + (1.0 - lab) * jnp.maximum(margin - d, 0.0) ** 2)


if __name__ == "__main__":
    key = jax.random.PRNGKey(0)
    k1, k2, k3, k4 = jax.random.split(key, 4)
    margin = 1.0

    # Case 1: small ragged 1-D pair distances (not a multiple of 128) -> tests padding path
    d1 = jax.random.uniform(k1, (257,), dtype=jnp.float32) * 2.0
    l1 = (jax.random.uniform(k2, (257,)) > 0.5).astype(jnp.float32)
    out1 = jax.block_until_ready(contrastive_loss(d1, l1, margin))
    ref1 = contrastive_loss_ref(d1, l1, margin)
    assert jnp.allclose(out1, ref1, rtol=1e-5, atol=1e-6), (out1, ref1)

    # Case 2: 2-D slab with a small tile to exercise multi-tile grid + the parallel chunk axis
    d2 = jax.random.uniform(k3, (64, 128), dtype=jnp.float32) * 2.0
    l2 = (jax.random.uniform(k4, (64, 128)) > 0.5).astype(jnp.float32)
    out2 = jax.block_until_ready(contrastive_loss(d2, l2, margin, tb=8))
    ref2 = contrastive_loss_ref(d2, l2, margin)
    assert jnp.allclose(out2, ref2, rtol=1e-5, atol=1e-6), (out2, ref2)

    print("KERNEL_OK")
</pallas_src>

<mosaic_0001>
module attributes {stable_mosaic.version = 11 : i64} {
  func.func @kernel(%arg0: i32, %arg1: i32, %arg2: memref<8x128xf32, #tpu.memory_space<vmem>>, %arg3: memref<8x128xbf16, #tpu.memory_space<vmem>>, %arg4: memref<8x128xf32, #tpu.memory_space<vmem>>, %arg5: memref<8x128xf32, #tpu.memory_space<vmem>>) attributes {dimension_semantics = [#tpu.dimension_semantics<parallel>, #tpu.dimension_semantics<arbitrary>], iteration_bounds = array<i64: 1, 1>, scalar_prefetch = 0 : i64, scratch_operands = 1 : i64, tpu.core_type = #tpu.core_type<tc>, window_params = [{transform_indices = @transform_0, window_bounds = array<i64: 8, 128>}, {transform_indices = @transform_1, window_bounds = array<i64: 8, 128>}, {transform_indices = @transform_2, window_bounds = array<i64: 8, 128>}]} {
    %c0_i32 = arith.constant 0 : i32
    %0 = arith.cmpi eq, %arg1, %c0_i32 : i32
    %1 = arith.extui %0 : i1 to i32
    %c0_i32_0 = arith.constant 0 : i32
    %2 = arith.cmpi ne, %1, %c0_i32_0 : i32
    scf.if %2 {
      %cst_12 = arith.constant 0.000000e+00 : f32
      %23 = vector.broadcast %cst_12 : f32 to vector<8x128xf32>
      %c0_13 = arith.constant 0 : index
      %c0_14 = arith.constant 0 : index
      %24 = vector.load %arg5[%c0_13, %c0_14] : memref<8x128xf32, #tpu.memory_space<vmem>>, vector<8x128xf32>
      tpu.vector_store %arg5[%c0_13, %c0_14], %23 {strides = array<i32>} : memref<8x128xf32, #tpu.memory_space<vmem>>, vector<8x128xf32>,
    } else {
    }
    %c0 = arith.constant 0 : index
    %c0_1 = arith.constant 0 : index
    %3 = vector.load %arg2[%c0, %c0_1] : memref<8x128xf32, #tpu.memory_space<vmem>>, vector<8x128xf32>
    %c0_2 = arith.constant 0 : index
    %c0_3 = arith.constant 0 : index
    %4 = vector.load %arg3[%c0_2, %c0_3] : memref<8x128xbf16, #tpu.memory_space<vmem>>, vector<8x128xbf16>
    %5 = arith.extf %4 : vector<8x128xbf16> to vector<8x128xf32>
    %cst = arith.constant 1.000000e+00 : f32
    %6 = vector.broadcast %cst : f32 to vector<8x128xf32>
    %7 = arith.subf %6, %3 : vector<8x128xf32>
    %cst_4 = arith.constant 0.000000e+00 : f32
    %8 = vector.broadcast %cst_4 : f32 to vector<8x128xf32>
    %9 = arith.maximumf %7, %8 : vector<8x128xf32>
    %c0_5 = arith.constant 0 : index
    %c0_6 = arith.constant 0 : index
    %10 = vector.load %arg5[%c0_5, %c0_6] : memref<8x128xf32, #tpu.memory_space<vmem>>, vector<8x128xf32>
    %11 = arith.mulf %3, %3 : vector<8x128xf32>
    %12 = arith.mulf %5, %11 : vector<8x128xf32>
    %cst_7 = arith.constant 1.000000e+00 : f32
    %13 = vector.broadcast %cst_7 : f32 to vector<8x128xf32>
    %14 = arith.subf %13, %5 : vector<8x128xf32>
    %15 = arith.mulf %9, %9 : vector<8x128xf32>
    %16 = arith.mulf %14, %15 : vector<8x128xf32>
    %17 = arith.addf %12, %16 : vector<8x128xf32>
    %18 = arith.addf %10, %17 : vector<8x128xf32>
    %c0_8 = arith.constant 0 : index
    %c0_9 = arith.constant 0 : index
    %19 = vector.load %arg5[%c0_8, %c0_9] : memref<8x128xf32, #tpu.memory_space<vmem>>, vector<8x128xf32>
    tpu.vector_store %arg5[%c0_8, %c0_9], %18 {strides = array<i32>} : memref<8x128xf32, #tpu.memory_space<vmem>>, vector<8x128xf32>,
    %c0_i32_10 = arith.constant 0 : i32
    %20 = arith.cmpi eq, %arg1, %c0_i32_10 : i32
    %21 = arith.extui %20 : i1 to i32
    %c0_i32_11 = arith.constant 0 : i32
    %22 = arith.cmpi ne, %21, %c0_i32_11 : i32
    scf.if %22 {
      %c0_12 = arith.constant 0 : index
      %c0_13 = arith.constant 0 : index
      %23 = vector.load %arg5[%c0_12, %c0_13] : memref<8x128xf32, #tpu.memory_space<vmem>>, vector<8x128xf32>
      %24 = vector.shape_cast %23 : vector<8x128xf32> to vector<1x8x128xf32>
      %cst_14 = arith.constant dense<0.000000e+00> : vector<8x128xf32>
      %25 = vector.multi_reduction <add>, %24, %cst_14 [0] : vector<1x8x128xf32> to vector<8x128xf32>
      %c0_15 = arith.constant 0 : index
      %c0_16 = arith.constant 0 : index
      %26 = vector.load %arg4[%c0_15, %c0_16] : memref<8x128xf32, #tpu.memory_space<vmem>>, vector<8x128xf32>
      tpu.vector_store %arg4[%c0_15, %c0_16], %25 {strides = array<i32>} : memref<8x128xf32, #tpu.memory_space<vmem>>, vector<8x128xf32>,
    } else {
    }
    return
  }
  func.func @transform_0(%arg0: i32, %arg1: i32) -> (i32, i32) {
    %c1_i32 = arith.constant 1 : i32
    %0 = arith.muli %arg0, %c1_i32 : i32
    %1 = arith.addi %0, %arg1 : i32
    %c0_i32 = arith.constant 0 : i32
    %c0_i32_0 = arith.constant 0 : i32
    return %1, %c0_i32 : i32, i32
  }
  func.func @transform_1(%arg0: i32, %arg1: i32) -> (i32, i32) {
    %c1_i32 = arith.constant 1 : i32
    %0 = arith.muli %arg0, %c1_i32 : i32
    %1 = arith.addi %0, %arg1 : i32
    %c0_i32 = arith.constant 0 : i32
    %c0_i32_0 = arith.constant 0 : i32
    return %1, %c0_i32 : i32, i32
  }
  func.func @transform_2(%arg0: i32, %arg1: i32) -> (i32, i32) {
    %c0_i32 = arith.constant 0 : i32
    %c0_i32_0 = arith.constant 0 : i32
    return %arg0, %c0_i32 : i32, i32
  }
}

</mosaic_0001>

<bundles_post_ra>
// kernel: tpu_custom_call.1
= control target key start
LH: loop header
LB: loop body
LE: loop exit
PB: predicated region body
PF: predicated region fallthrough
CT: control target
= control target key end

     0   :  { %7 = vsyncpa [#allocation4], 0  ;;  %s214_s0 = inlined_call_operand.hbm [shape: f32[8,128], index: 0, kind: input, shape index: {}]   ;;  %s215_s1 = inlined_call_operand.hbm [shape: bf16[8,128], index: 1, kind: input, shape index: {}]   ;;  %s216_s2 = inlined_call_operand.hbm [shape: f32[8,128], index: 2, kind: output, shape index: {}]  }
   0x1   :  { %8 = vsyncpa [#allocation7], 0 }
   0x2   :  { %9 = vsyncpa [#allocation5], 0  ;;  %s160_s9 = smov [#allocation3]   ;;  %s161_s11 = smov [#allocation6]  }
   0x3   :  { %s19_s10 = sshll.u32 %s160_s9, 4  ;;  %s32_s12 = sshll.u32 %s161_s11, 4  ;;  %s20_s10 = int_to_ptr.vmem [resolvable:$true] %s19_s10  ;;  %s33_s12 = int_to_ptr.vmem [resolvable:$true] %s32_s12 }
   0x4   :  { %s88_s15 = scalar_lea.hbm %s214_s0, 128 }
   0x5   :  { %p89_p0 = scmp.ne.s32.totalorder %s214_s0, %s88_s15  ;;  %p92_p1 = scmp.lt.u32.totalorder %s88_s15, %s214_s0 }
   0x7   :  { %p94_p2 = pnand %p92_p1, %p89_p0 }
   0x9   :  { %97 = shalt.err (!%p94_p2)
}
   0xa   :  { %s98_s20 = scalar_lea.vmem %s20_s10, 128  ;;  %p103_p4 = scmp.lt.s32.totalorder %s20_s10, %s20_s10 }
   0xb   :  { %p99_p3 = scmp.ne.s32.totalorder %s20_s10, %s98_s20  ;;  %p104_p5 = scmp.lt.s32.totalorder %s98_s20, %s98_s20 }
   0xd   :  { %p105_p6 = por %p104_p5, %p103_p4 }
   0xf   :  { %p106_p7 = pnand %p105_p6, %p99_p3 }
  0x11   :  { %109 = shalt.err (!%p106_p7)
}
  0x12   :  { %22 = dma.hbm_to_vmem [thread:$0]  %s214_s0, 128, %s20_s10, [#allocation4]  }
  0x13   :  { %s110_s25 = scalar_lea.hbm %s215_s1, 64 }
  0x14   :  { %p111_p8 = scmp.ne.s32.totalorder %s215_s1, %s110_s25  ;;  %p114_p9 = scmp.lt.u32.totalorder %s110_s25, %s215_s1 }
  0x16   :  { %p116_p10 = pnand %p114_p9, %p111_p8 }
  0x18   :  { %119 = shalt.err (!%p116_p10)
}
  0x19   :  { %s120_s30 = scalar_lea.vmem %s33_s12, 64  ;;  %p125_p12 = scmp.lt.s32.totalorder %s33_s12, %s33_s12 }
  0x1a   :  { %p121_p11 = scmp.ne.s32.totalorder %s33_s12, %s120_s30  ;;  %p126_p13 = scmp.lt.s32.totalorder %s120_s30, %s120_s30 }
  0x1c   :  { %p127_p0 = por %p126_p13, %p125_p12 }
  0x1e   :  { %p128_p1 = pnand %p127_p0, %p121_p11 }
  0x20   :  { %131 = shalt.err (!%p128_p1)
}
  0x21   :  { %35 = dma.hbm_to_vmem [thread:$0]  %s215_s1, 64, %s33_s12, [#allocation7]  }
  0x22   :  { %154 = dma.done.wait [#allocation4], 128  }
  0x23   :  { %155 = vsyncadd [#allocation4], 4294967168 }
  0x24   :  { %156 = dma.done.wait [#allocation7], 64  }
  0x25   :  { %157 = vsyncadd [#allocation7], 4294967232  ;;  %v49_v0 = vld [vmem:[#allocation3] sm:$0xff]  ;;  %v50_v1 = vld [vmem:[#allocation6] sm:$0xf]  ;;  %s162_s4 = smov [#allocation8]  }
  0x26   :  { %v51_v2 = vunpack.c.l.bf16 %v50_v1  ;;  %v52_v3 = vsub.f32 1.0, %v49_v0  ;;  %v55_v4 = vmul.f32 %v49_v0, %v49_v0  ;;  %s75_s5 = sshll.u32 %s162_s4, 4  ;;  %s76_s5 = int_to_ptr.vmem [resolvable:$true] %s75_s5 }
  0x27   :  { %s132_s1 = scalar_lea.vmem %s76_s5, 128  ;;  %p137_p3 = scmp.lt.s32.totalorder %s76_s5, %s76_s5 }
  0x28   :  { %v53_v5 = vmax.f32 %v52_v3, 0.0  ;;  %v57_v6 = vsub.f32 1.0, %v51_v2  ;;  %v56_v7 = vmul.f32 %v55_v4, %v51_v2  ;;  %p133_p2 = scmp.ne.s32.totalorder %s76_s5, %s132_s1  ;;  %p138_p4 = scmp.lt.s32.totalorder %s132_s1, %s132_s1 }
  0x2a   :  { %v58_v8 = vmul.f32 %v53_v5, %v53_v5  ;;  %p139_p5 = por %p138_p4, %p137_p3 }
  0x2c   :  { %v59_v9 = vmul.f32 %v58_v8, %v57_v6  ;;  %p140_p6 = pnand %p139_p5, %p133_p2 }
  0x2e   :  { %v60_v10 = vadd.f32 %v59_v9, %v56_v7 }
  0x30   :  { %68 = vst [vmem:[#allocation8] sm:$0xff] %v60_v10 }
  0x31   :  { %143 = shalt.err (!%p140_p6)
}
  0x32   :  { %s144_s8 = scalar_lea.hbm %s216_s2, 128 }
  0x33   :  { %p145_p7 = scmp.ne.s32.totalorder %s216_s2, %s144_s8  ;;  %p148_p8 = scmp.lt.u32.totalorder %s144_s8, %s216_s2 }
  0x35   :  { %p150_p9 = pnand %p148_p8, %p145_p7 }
  0x37   :  { %153 = shalt.err (!%p150_p9)
}
  0x38   :  { %78 = dma.vmem_to_hbm [thread:$0]  %s76_s5, 128, %s216_s2, [#allocation5]  }
  0x39   :  { %158 = dma.done.wait [#allocation5], 128  }
  0x3a   :  { %159 = vsyncadd [#allocation5], 4294967168 }
  0x3b   :  { %82 = vsyncpa [#allocation4], 1 }
  0x3c   :  { %83 = vsyncpa [#allocation7], 1 }
  0x3d   :  { %84 = vsyncpa [#allocation5], 1 }

</bundles_post_ra>
